<compile_context>
chip_gen: v7x
topology: tpu7x:2x2x1
jax: 0.10.0
libtpu: 0.0.40
codegen_flags: <defaults>
</compile_context>

<pallas_src>
import functools

import jax
import jax.numpy as jnp
from jax.experimental import pallas as pl
from jax.experimental.pallas import tpu as pltpu

STATE_DIM = 4        # CartPole-v1 observation dim
HIDDEN_DIM = 128
ACTION_DIM = 2       # CartPole-v1 action dim
PADDED_ACTION_DIM = 128   # lane-dense output width (zero-padded fc2 columns)


def _round_up(x, m):
    return ((x + m - 1) // m) * m


def qnet_kernel(x_ref, w1_ref, b1_ref, w2_ref, b2_ref, o_ref):
    # Block shapes:
    #   x_ref : (TILE_B, STATE_DIM)        w1_ref: (STATE_DIM, HIDDEN_DIM)
    #   b1_ref: (1, HIDDEN_DIM)            w2_ref: (HIDDEN_DIM, PADDED_ACTION_DIM)
    #   b2_ref: (1, PADDED_ACTION_DIM)     o_ref : (TILE_B, PADDED_ACTION_DIM)
    x = x_ref[...]
    w1 = w1_ref[...]
    tile_b = x.shape[0]

    # fc1 on the VPU: the K=4 contraction as 4 broadcast multiply-adds
    # (avoids a degenerate 4-deep MXU matmul / MRF drain).
    h = jnp.broadcast_to(b1_ref[...], (tile_b, HIDDEN_DIM))
    for k in range(STATE_DIM):                       # static, fully unrolled
        h = h + x[:, k:k + 1] * w1[k:k + 1, :]
    h = jnp.maximum(h, 0.0)                          # ReLU

    # fc2 on the MXU: (TILE_B,128) @ (128,128) -> lane-dense (TILE_B,128) output.
    q = jnp.dot(h, w2_ref[...], preferred_element_type=jnp.float32) + b2_ref[...]
    o_ref[...] = q.astype(o_ref.dtype)


@functools.partial(jax.jit, static_argnames=("tile_b",))
def qnet_forward(x, w1, b1, w2, b2, *, tile_b=None):
    B = x.shape[0]
    if tile_b is None:
        # Small action-selection batches: just round to the 8-row sublane granularity.
        # Large training batches: 128-row tiles fill the MXU M dimension.
        tile_b = min(128, _round_up(B, 8))

    b_pad = _round_up(B, tile_b)
    if b_pad != B:
        x = jnp.pad(x, ((0, b_pad - B), (0, 0)))

    # Zero-pad fc2 to a lane-dense 128-column output; padded columns produce zeros.
    w2p = jnp.pad(w2, ((0, 0), (0, PADDED_ACTION_DIM - ACTION_DIM)))
    b2p = jnp.pad(b2, ((0, 0), (0, PADDED_ACTION_DIM - ACTION_DIM)))

    grid = (b_pad // tile_b,)
    out = pl.pallas_call(
        qnet_kernel,
        out_shape=jax.ShapeDtypeStruct((b_pad, PADDED_ACTION_DIM), jnp.float32),
        grid_spec=pltpu.PrefetchScalarGridSpec(
            num_scalar_prefetch=0,
            grid=grid,
            in_specs=[
                pl.BlockSpec((tile_b, STATE_DIM), lambda i: (i, 0)),
                pl.BlockSpec((STATE_DIM, HIDDEN_DIM), lambda i: (0, 0)),
                pl.BlockSpec((1, HIDDEN_DIM), lambda i: (0, 0)),
                pl.BlockSpec((HIDDEN_DIM, PADDED_ACTION_DIM), lambda i: (0, 0)),
                pl.BlockSpec((1, PADDED_ACTION_DIM), lambda i: (0, 0)),
            ],
            out_specs=pl.BlockSpec((tile_b, PADDED_ACTION_DIM), lambda i: (i, 0)),
        ),
        compiler_params=pltpu.CompilerParams(
            dimension_semantics=("parallel",)),
    )(x, w1, b1, w2p, b2p)

    # Slice away the batch/action padding (cheap XLA slice; kernel stores stay lane-dense).
    return out[:B, :ACTION_DIM]


def init_params(key):
    # Deterministic init mimicking torch.nn.Linear default (uniform +/- 1/sqrt(fan_in)).
    k1, k2, k3, k4 = jax.random.split(key, 4)
    lim1 = 1.0 / jnp.sqrt(jnp.float32(STATE_DIM))
    lim2 = 1.0 / jnp.sqrt(jnp.float32(HIDDEN_DIM))
    w1 = jax.random.uniform(k1, (STATE_DIM, HIDDEN_DIM), jnp.float32, -lim1, lim1)
    b1 = jax.random.uniform(k2, (1, HIDDEN_DIM), jnp.float32, -lim1, lim1)
    w2 = jax.random.uniform(k3, (HIDDEN_DIM, ACTION_DIM), jnp.float32, -lim2, lim2)
    b2 = jax.random.uniform(k4, (1, ACTION_DIM), jnp.float32, -lim2, lim2)
    return w1, b1, w2, b2


def _reference(x, w1, b1, w2, b2):
    return jnp.maximum(x @ w1 + b1, 0.0) @ w2 + b2


if __name__ == "__main__":
    key = jax.random.PRNGKey(0)
    k_params, k_x_small, k_x_big = jax.random.split(key, 3)
    w1, b1, w2, b2 = init_params(k_params)

    # Small action-selection batch (exercises 8-row padding path).
    B_small = 2
    x_small = jax.random.normal(k_x_small, (B_small, STATE_DIM), jnp.float32)
    q_small = qnet_forward(x_small, w1, b1, w2, b2)
    jax.block_until_ready(q_small)
    assert q_small.shape == (B_small, ACTION_DIM)
    assert jnp.allclose(q_small, _reference(x_small, w1, b1, w2, b2),
                        atol=1e-4, rtol=1e-4)

    # Replay-buffer-sized batch (exercises the 128-row tiled, multi-grid-point path).
    B_big = 256
    x_big = jax.random.normal(k_x_big, (B_big, STATE_DIM), jnp.float32)
    q_big = qnet_forward(x_big, w1, b1, w2, b2)
    jax.block_until_ready(q_big)
    assert q_big.shape == (B_big, ACTION_DIM)
    assert jnp.allclose(q_big, _reference(x_big, w1, b1, w2, b2),
                        atol=1e-4, rtol=1e-4)

    print("KERNEL_OK")
</pallas_src>

<mosaic_0001>
module attributes {stable_mosaic.version = 11 : i64} {
  func.func @qnet_kernel(%arg0: i32, %arg1: memref<8x4xf32, #tpu.memory_space<vmem>>, %arg2: memref<4x128xf32, #tpu.memory_space<vmem>>, %arg3: memref<1x128xf32, #tpu.memory_space<vmem>>, %arg4: memref<128x128xf32, #tpu.memory_space<vmem>>, %arg5: memref<1x128xf32, #tpu.memory_space<vmem>>, %arg6: memref<8x128xf32, #tpu.memory_space<vmem>>) attributes {dimension_semantics = [#tpu.dimension_semantics<parallel>], iteration_bounds = array<i64: 1>, scalar_prefetch = 0 : i64, scratch_operands = 0 : i64, tpu.core_type = #tpu.core_type<tc>, window_params = [{transform_indices = @transform_0, window_bounds = array<i64: 8, 4>}, {pipeline_mode = #tpu.pipeline_mode<synchronous>, transform_indices = @transform_1, window_bounds = array<i64: 4, 128>}, {pipeline_mode = #tpu.pipeline_mode<synchronous>, transform_indices = @transform_2, window_bounds = array<i64: 1, 128>}, {pipeline_mode = #tpu.pipeline_mode<synchronous>, transform_indices = @transform_3, window_bounds = array<i64: 128, 128>}, {pipeline_mode = #tpu.pipeline_mode<synchronous>, transform_indices = @transform_4, window_bounds = array<i64: 1, 128>}, {transform_indices = @transform_5, window_bounds = array<i64: 8, 128>}]} {
    %c0 = arith.constant 0 : index
    %c0_0 = arith.constant 0 : index
    %0 = vector.load %arg1[%c0, %c0_0] : memref<8x4xf32, #tpu.memory_space<vmem>>, vector<8x4xf32>
    %c0_1 = arith.constant 0 : index
    %c0_2 = arith.constant 0 : index
    %1 = vector.load %arg2[%c0_1, %c0_2] : memref<4x128xf32, #tpu.memory_space<vmem>>, vector<4x128xf32>
    %c0_3 = arith.constant 0 : index
    %c0_4 = arith.constant 0 : index
    %2 = vector.load %arg3[%c0_3, %c0_4] : memref<1x128xf32, #tpu.memory_space<vmem>>, vector<1x128xf32>
    %3 = vector.shape_cast %2 : vector<1x128xf32> to vector<1x128xf32>
    %4 = vector.broadcast %3 : vector<1x128xf32> to vector<8x128xf32>
    %5 = vector.extract_strided_slice %0 {offsets = [0, 0], sizes = [8, 1], strides = [1, 1]} : vector<8x4xf32> to vector<8x1xf32>
    %6 = vector.extract_strided_slice %1 {offsets = [0, 0], sizes = [1, 128], strides = [1, 1]} : vector<4x128xf32> to vector<1x128xf32>
    %7 = vector.broadcast %5 : vector<8x1xf32> to vector<8x128xf32>
    %8 = vector.broadcast %6 : vector<1x128xf32> to vector<8x128xf32>
    %9 = arith.mulf %7, %8 : vector<8x128xf32>
    %10 = arith.addf %4, %9 : vector<8x128xf32>
    %11 = vector.extract_strided_slice %0 {offsets = [0, 1], sizes = [8, 1], strides = [1, 1]} : vector<8x4xf32> to vector<8x1xf32>
    %12 = vector.extract_strided_slice %1 {offsets = [1, 0], sizes = [1, 128], strides = [1, 1]} : vector<4x128xf32> to vector<1x128xf32>
    %13 = vector.broadcast %11 : vector<8x1xf32> to vector<8x128xf32>
    %14 = vector.broadcast %12 : vector<1x128xf32> to vector<8x128xf32>
    %15 = arith.mulf %13, %14 : vector<8x128xf32>
    %16 = arith.addf %10, %15 : vector<8x128xf32>
    %17 = vector.extract_strided_slice %0 {offsets = [0, 2], sizes = [8, 1], strides = [1, 1]} : vector<8x4xf32> to vector<8x1xf32>
    %18 = vector.extract_strided_slice %1 {offsets = [2, 0], sizes = [1, 128], strides = [1, 1]} : vector<4x128xf32> to vector<1x128xf32>
    %19 = vector.broadcast %17 : vector<8x1xf32> to vector<8x128xf32>
    %20 = vector.broadcast %18 : vector<1x128xf32> to vector<8x128xf32>
    %21 = arith.mulf %19, %20 : vector<8x128xf32>
    %22 = arith.addf %16, %21 : vector<8x128xf32>
    %23 = vector.extract_strided_slice %0 {offsets = [0, 3], sizes = [8, 1], strides = [1, 1]} : vector<8x4xf32> to vector<8x1xf32>
    %24 = vector.extract_strided_slice %1 {offsets = [3, 0], sizes = [1, 128], strides = [1, 1]} : vector<4x128xf32> to vector<1x128xf32>
    %25 = vector.broadcast %23 : vector<8x1xf32> to vector<8x128xf32>
    %26 = vector.broadcast %24 : vector<1x128xf32> to vector<8x128xf32>
    %27 = arith.mulf %25, %26 : vector<8x128xf32>
    %28 = arith.addf %22, %27 : vector<8x128xf32>
    %cst = arith.constant 0.000000e+00 : f32
    %29 = vector.broadcast %cst : f32 to vector<8x128xf32>
    %30 = arith.maximumf %28, %29 : vector<8x128xf32>
    %c0_5 = arith.constant 0 : index
    %c0_6 = arith.constant 0 : index
    %31 = vector.load %arg4[%c0_5, %c0_6] : memref<128x128xf32, #tpu.memory_space<vmem>>, vector<128x128xf32>
    %cst_7 = arith.constant dense<0.000000e+00> : vector<8x128xf32>
    %32 = tpu.matmul %30, %31, %cst_7 {dimension_numbers = #tpu.dot_dimension_numbers<[1], [0], [0], [1], [0, 0, 1, 1], [], []>} : vector<8x128xf32>, vector<128x128xf32>, vector<8x128xf32> -> vector<8x128xf32>
    %c0_8 = arith.constant 0 : index
    %c0_9 = arith.constant 0 : index
    %33 = vector.load %arg5[%c0_8, %c0_9] : memref<1x128xf32, #tpu.memory_space<vmem>>, vector<1x128xf32>
    %34 = vector.broadcast %33 : vector<1x128xf32> to vector<8x128xf32>
    %35 = arith.addf %32, %34 : vector<8x128xf32>
    %c0_10 = arith.constant 0 : index
    %c0_11 = arith.constant 0 : index
    %36 = vector.load %arg6[%c0_10, %c0_11] : memref<8x128xf32, #tpu.memory_space<vmem>>, vector<8x128xf32>
    tpu.vector_store %arg6[%c0_10, %c0_11], %35 {strides = array<i32>} : memref<8x128xf32, #tpu.memory_space<vmem>>, vector<8x128xf32>,
    return
  }
  func.func @transform_0(%arg0: i32) -> (i32, i32) {
    %c0_i32 = arith.constant 0 : i32
    %c0_i32_0 = arith.constant 0 : i32
    return %arg0, %c0_i32 : i32, i32
  }
  func.func @transform_1(%arg0: i32) -> (i32, i32) {
    %c0_i32 = arith.constant 0 : i32
    %c0_i32_0 = arith.constant 0 : i32
    %c0_i32_1 = arith.constant 0 : i32
    return %c0_i32, %c0_i32_0 : i32, i32
  }
  func.func @transform_2(%arg0: i32) -> (i32, i32) {
    %c0_i32 = arith.constant 0 : i32
    %c0_i32_0 = arith.constant 0 : i32
    %c0_i32_1 = arith.constant 0 : i32
    return %c0_i32, %c0_i32_0 : i32, i32
  }
  func.func @transform_3(%arg0: i32) -> (i32, i32) {
    %c0_i32 = arith.constant 0 : i32
    %c0_i32_0 = arith.constant 0 : i32
    %c0_i32_1 = arith.constant 0 : i32
    return %c0_i32, %c0_i32_0 : i32, i32
  }
  func.func @transform_4(%arg0: i32) -> (i32, i32) {
    %c0_i32 = arith.constant 0 : i32
    %c0_i32_0 = arith.constant 0 : i32
    %c0_i32_1 = arith.constant 0 : i32
    return %c0_i32, %c0_i32_0 : i32, i32
  }
  func.func @transform_5(%arg0: i32) -> (i32, i32) {
    %c0_i32 = arith.constant 0 : i32
    %c0_i32_0 = arith.constant 0 : i32
    return %arg0, %c0_i32 : i32, i32
  }
}

</mosaic_0001>

<bundles_post_ra>
// kernel: qnet_forward.1
= control target key start
LH: loop header
LB: loop body
LE: loop exit
PB: predicated region body
PF: predicated region fallthrough
CT: control target
= control target key end

     0   :  { %v259_v0 = vmov 0   ;;  %v260_v2 = vmov 2   ;;  %v261_v8 = vmov 0.0|0.0   ;;  %v262_v12 = vmov 1   ;;  %s359_s0 = inlined_call_operand.vmem [shape: f32[8,4], index: 0, kind: input, shape index: {}]   ;;  %s360_s3 = inlined_call_operand.vmem [shape: f32[128,128], index: 3, kind: input, shape index: {}]   ;;  %s361_s1 = inlined_call_operand.vmem [shape: f32[4,128], index: 1, kind: input, shape index: {}]   ;;  %s362_s2 = inlined_call_operand.vmem [shape: f32[1,128], index: 2, kind: input, shape index: {}]   ;;  %s363_s4 = inlined_call_operand.vmem [shape: f32[1,128], index: 4, kind: input, shape index: {}]   ;;  %s364_s5 = inlined_call_operand.vmem [shape: f32[8,128], index: 5, kind: output, shape index: {}]  }
   0x1   :  { %254 = vset.pattern.permute.xlu0 %v259_v0  ;;  %v20_v1 = vld [vmem:[%s359_s0] sm:$0xff]  ;;  %256 = vset.pattern.permute.xlu1 %v260_v2  ;;  %v72_v4 = vld [vmem:[%s360_s3 + $0x8] sm:$0xff]  ;;  %v73_v6 = vld [vmem:[%s360_s3 + $0x10] sm:$0xff]  ;;  %v263_v13 = vmov 3   ;;  %vm264_vm0 = vmmov 0   ;;  %v265_v21 = vmov 0.0   ;;  %v34_v31 = vlaneseq }
   0x2   :  { %v71_v3 = vld [vmem:[%s360_s3] sm:$0xff]  ;;  %31 = vperm.xlu0 %254, %v20_v1   ;;  %51 = vperm.xlu1 %256, %v20_v1   ;;  %v74_v7 = vld [vmem:[%s360_s3 + $0x18] sm:$0xff]  ;;  %v76_v11 = vld [vmem:[%s360_s3 + $0x28] sm:$0xff] }
   0x3   :  { %v224_v5 = vpack.c.bf16 %v72_v4, %v71_v3  ;;  %223 = vmatprep.subr.bf16.mxu0 %v261_v8  ;;  %v227_v9 = vpack.c.bf16 %v74_v7, %v73_v6  ;;  %v75_v10 = vld [vmem:[%s360_s3 + $0x20] sm:$0xff]  ;;  %v77_v15 = vld [vmem:[%s360_s3 + $0x30] sm:$0xff]  ;;  %v78_v16 = vld [vmem:[%s360_s3 + $0x38] sm:$0xff]  ;;  %220 = vmatprep.mubr.msk.f32.mxu0 %vm264_vm0, %v265_v21  ;;  %v35_v32 = vshrl.u32 %v34_v31, 7 }
   0x4   :  { %v230_v14 = vpack.c.bf16 %v76_v11, %v75_v10  ;;  %v233_v17 = vpack.c.bf16 %v78_v16, %v77_v15  ;;  %v79_v18 = vld [vmem:[%s360_s3 + $0x40] sm:$0xff]  ;;  %v80_v19 = vld [vmem:[%s360_s3 + $0x48] sm:$0xff]  ;;  %v81_v22 = vld [vmem:[%s360_s3 + $0x50] sm:$0xff] }
   0x5   :  { %225 = vmatpush3.bf16.msra.mxu0 %v224_v5  ;;  %v236_v20 = vpack.c.bf16 %v80_v19, %v79_v18  ;;  %v82_v23 = vld [vmem:[%s360_s3 + $0x58] sm:$0xff]  ;;  %v83_v25 = vld [vmem:[%s360_s3 + $0x60] sm:$0xff]  ;;  %v84_v26 = vld [vmem:[%s360_s3 + $0x68] sm:$0xff]  ;;  %v36_v33 = vsub.s32 0, %v35_v32  ;;  %v46_v36 = vsub.s32 1, %v35_v32  ;;  %v56_v38 = vsub.s32 2, %v35_v32 }
   0x6   :  { %226 = vmatprep.subr.bf16.mxu0 %v261_v8  ;;  %255 = vset.pattern.permute.xlu0 %v262_v12  ;;  %v239_v24 = vpack.c.bf16 %v82_v23, %v81_v22  ;;  %v242_v27 = vpack.c.bf16 %v84_v26, %v83_v25  ;;  %v85_v28 = vld [vmem:[%s360_s3 + $0x70] sm:$0xff]  ;;  %v86_v29 = vld [vmem:[%s360_s3 + $0x78] sm:$0xff]  ;;  %v21_v34 = vld [vmem:[%s361_s1] sm:$0xf]  ;;  %v66_v40 = vsub.s32 3, %v35_v32 }
   0x7   :  { %257 = vset.pattern.permute.xlu1 %v263_v13  ;;  %41 = vperm.xlu0 %255, %v20_v1   ;;  %v245_v30 = vpack.c.bf16 %v86_v29, %v85_v28  ;;  %v37_v35 = vrot.slane %v21_v34, %v36_v33  ;;  %v47_v42 = vrot.slane %v21_v34, %v46_v36  ;;  %v169_v43 = vld [vmem:[%s362_s2] ss:$0 sm:$0xff] }
   0x8   :  { %61 = vperm.xlu1 %257, %v20_v1   ;;  %v57_v44 = vrot.slane %v21_v34, %v56_v38  ;;  %v67_v45 = vrot.slane %v21_v34, %v66_v40  ;;  %v170_v56 = vld [vmem:[%s363_s4] ss:$0 sm:$0xff] }
   0x9   :  { %228 = vmatpush3.bf16.msra.mxu0 %v227_v9 }
   0xa   :  { %229 = vmatprep.subr.bf16.mxu0 %v261_v8 }
   0xb   :  { %258 = vset.pattern.permute.xlu0 %v263_v13 }
   0xd   :  { %231 = vmatpush3.bf16.msra.mxu0 %v230_v14 }
   0xe   :  { %232 = vmatprep.subr.bf16.mxu0 %v261_v8 }
  0x11   :  { %234 = vmatpush3.bf16.msra.mxu0 %v233_v17 }
  0x12   :  { %235 = vmatprep.subr.bf16.mxu0 %v261_v8 }
  0x15   :  { %237 = vmatpush3.bf16.msra.mxu0 %v236_v20 }
  0x16   :  { %238 = vmatprep.subr.bf16.mxu0 %v261_v8 }
  0x19   :  { %240 = vmatpush3.bf16.msra.mxu0 %v239_v24 }
  0x1a   :  { %241 = vmatprep.subr.bf16.mxu0 %v261_v8 }
  0x1d   :  { %243 = vmatpush3.bf16.msra.mxu0 %v242_v27 }
  0x1e   :  { %244 = vmatprep.subr.bf16.mxu0 %v261_v8 }
  0x21   :  { %246 = vmatpush3.bf16.msra.mxu0 %v245_v30 }
  0x81   :  { %v32_v37 = vpop.permute.xlu0 %31  ;;  %v52_v39 = vpop.permute.xlu1 %51 }
  0x82   :  { %v38_v41 = vmul.f32 %v37_v35, %v32_v37  ;;  %v58_v50 = vmul.f32 %v57_v44, %v52_v39 }
  0x84   :  { %v39_v48 = vadd.f32 %v169_v43, %v38_v41 }
  0x86   :  { %v42_v46 = vpop.permute.xlu0 %41 }
  0x87   :  { %v62_v47 = vpop.permute.xlu1 %61  ;;  %v48_v49 = vmul.f32 %v47_v42, %v42_v46 }
  0x88   :  { %v68_v52 = vmul.f32 %v67_v45, %v62_v47 }
  0x89   :  { %v49_v51 = vadd.f32 %v48_v49, %v39_v48 }
  0x8b   :  { %v59_v53 = vadd.f32 %v58_v50, %v49_v51 }
  0x8d   :  { %v69_v54 = vadd.f32 %v68_v52, %v59_v53 }
  0x8f   :  { %v70_v55 = vmax.f32 %v69_v54, 0.0 }
  0x91   :  { %221 = vmatmul.mubr.f32.vlgmr.msra.gmra.mrb[0].mxu0 %v70_v55 }
 0x164   :  { %v160_v57 = vpop.f32.mrb[0].mxu0 }
 0x165   :  { %v161_v58 = vadd.f32 %v170_v56, %v160_v57  ;;  %v222_v59 = vpop.f32.mrb[1].mxu0 }
 0x167   :  { %164 = vst [vmem:[%s364_s5] sm:$0xff] %v161_v58 }

</bundles_post_ra>
